<compile_context>
chip_gen: v6e
topology: v6e:2x2x1
jax: 0.10.0
libtpu: 0.0.40
codegen_flags: <defaults>
</compile_context>

<pallas_src>
import functools

import jax
import jax.numpy as jnp
from jax.experimental import pallas as pl
from jax.experimental.pallas import tpu as pltpu

LN_EPS = 1e-5  # torch.nn.LayerNorm default


def _round_up(x, m):
    return (x + m - 1) // m * m


def _mlp_body(x_k_ref, x_res_ref, wt_ref, b_ref, g_ref, be_ref, o_ref, acc_ref,
              *, n_valid):
    """Shared kernel body.

    x_k_ref:   (tm, tk)      slice of input features for this K step (contraction)
    x_res_ref: (tm, n_pad)   full input row (residual); may alias x_k_ref
    wt_ref:    (tk, n_pad)   transposed-weight slice
    b/g/be:    (1, n_pad)    Linear bias, LayerNorm gamma/beta (zero padded)
    o_ref:     (tm, n_pad)   output tile
    acc_ref:   (tm, n_pad)   f32 accumulator scratch
    """
    k = pl.program_id(1)

    @pl.when(k == 0)
    def _():
        acc_ref[...] = jnp.zeros_like(acc_ref)

    # delta(x) = Linear(ReLU(x)) — partial product for this K slice.
    # Native dtype straight into the MXU, f32 accumulation.
    h = jnp.maximum(x_k_ref[...], 0)
    acc_ref[...] += jnp.dot(h, wt_ref[...], preferred_element_type=jnp.float32)

    @pl.when(k == pl.num_programs(1) - 1)
    def _():
        y = acc_ref[...] + b_ref[...].astype(jnp.float32)
        # Padded feature columns of y are exactly zero (zero-padded Wt / bias),
        # so sums over all lanes equal sums over the real n_valid features.
        inv_n = jnp.float32(1.0 / n_valid)
        mean = jnp.sum(y, axis=-1, keepdims=True) * inv_n
        col = jax.lax.broadcasted_iota(jnp.int32, y.shape, 1)
        valid = (col < n_valid).astype(jnp.float32)
        centered = (y - mean) * valid
        var = jnp.sum(centered * centered, axis=-1, keepdims=True) * inv_n
        y_norm = (y - mean) * jax.lax.rsqrt(var + LN_EPS)
        y_ln = (y_norm * g_ref[...].astype(jnp.float32)
                + be_ref[...].astype(jnp.float32))
        # residual (padded gamma/beta are zero -> padded output columns stay 0)
        o_ref[...] = (x_res_ref[...].astype(jnp.float32) + y_ln).astype(o_ref.dtype)


def mlp_kernel_fused(x_ref, wt_ref, b_ref, g_ref, be_ref, o_ref, acc_ref, *, n_valid):
    # Single K step: the contraction block already is the full row -> reuse it
    # as the residual (avoids streaming x twice from HBM).
    _mlp_body(x_ref, x_ref, wt_ref, b_ref, g_ref, be_ref, o_ref, acc_ref,
              n_valid=n_valid)


def mlp_kernel_split(x_k_ref, x_res_ref, wt_ref, b_ref, g_ref, be_ref, o_ref,
                     acc_ref, *, n_valid):
    _mlp_body(x_k_ref, x_res_ref, wt_ref, b_ref, g_ref, be_ref, o_ref, acc_ref,
              n_valid=n_valid)


def mlp_forward(x, w, b, gamma, beta, *, tm=256,
                vmem_budget_bytes=48 * 1024 * 1024):
    """x: [B, n_dim]; w: [n_dim, n_dim] (PyTorch [out, in]); b/gamma/beta: [n_dim]."""
    B, n_dim = x.shape
    assert w.shape == (n_dim, n_dim)

    n_pad = _round_up(n_dim, 128)                 # lane-dense feature dim
    x_isz = jnp.dtype(x.dtype).itemsize
    w_isz = jnp.dtype(w.dtype).itemsize

    def est_vmem(tm_c, tk_c):
        sep = tk_c != n_pad
        v = 2 * tm_c * tk_c * x_isz                       # x contraction slices
        v += (2 * tm_c * n_pad * x_isz) if sep else 0     # x residual rows
        v += 2 * tk_c * n_pad * w_isz                     # weight slices
        v += 2 * tm_c * n_pad * x_isz                     # output blocks
        v += tm_c * n_pad * 4                             # f32 accumulator
        v += 6 * n_pad * 4                                # bias/gamma/beta
        return v

    # Batch tile: large by default, multiple of 8 sublanes, clamped so tiny
    # batches are not over-padded and big batches leave >=2 grid steps
    # (keeps both v7x TensorCores busy on the "parallel" axis).
    b8 = _round_up(B, 8)
    tm_c = min(tm, max(8, _round_up(b8 // 2, 8)))
    tm_c = _round_up(tm_c, 8)

    # K tile: largest multiple-of-128 divisor of n_pad whose working set fits
    # the VMEM budget (fits v7x's 64 MiB); shrink the batch tile only if even
    # tk=128 does not fit.
    while True:
        tk_c = None
        cand = n_pad
        while cand >= 128:
            if n_pad % cand == 0 and est_vmem(tm_c, cand) <= vmem_budget_bytes:
                tk_c = cand
                break
            cand -= 128
        if tk_c is not None or tm_c <= 8:
            if tk_c is None:
                tk_c = 128
            break
        tm_c = max(8, _round_up(tm_c // 2, 8))

    n_k = n_pad // tk_c
    separate_residual = n_k > 1
    B_pad = _round_up(B, tm_c)

    # Zero-pad to tile-aligned shapes (keeps LayerNorm exact, see kernel).
    wt = w.T  # -> [in, out]
    if B_pad == B and n_pad == n_dim:
        xp, wtp = x, wt
        bp = b.reshape(1, n_dim)
        gp = gamma.reshape(1, n_dim)
        betap = beta.reshape(1, n_dim)
    else:
        xp = jnp.zeros((B_pad, n_pad), x.dtype).at[:B, :n_dim].set(x)
        wtp = jnp.zeros((n_pad, n_pad), w.dtype).at[:n_dim, :n_dim].set(wt)
        bp = jnp.zeros((1, n_pad), b.dtype).at[0, :n_dim].set(b)
        gp = jnp.zeros((1, n_pad), gamma.dtype).at[0, :n_dim].set(gamma)
        betap = jnp.zeros((1, n_pad), beta.dtype).at[0, :n_dim].set(beta)

    if separate_residual:
        kernel = functools.partial(mlp_kernel_split, n_valid=n_dim)
        in_specs = [
            pl.BlockSpec((tm_c, tk_c), lambda i, k: (i, k)),    # x (contraction slice)
            pl.BlockSpec((tm_c, n_pad), lambda i, k: (i, 0)),   # x (residual row)
        ]
        operands = [xp, xp]
    else:
        kernel = functools.partial(mlp_kernel_fused, n_valid=n_dim)
        in_specs = [pl.BlockSpec((tm_c, n_pad), lambda i, k: (i, 0))]  # x full row
        operands = [xp]

    in_specs += [
        pl.BlockSpec((tk_c, n_pad), lambda i, k: (k, 0)),       # Wt slice
        pl.BlockSpec((1, n_pad), lambda i, k: (0, 0)),          # bias
        pl.BlockSpec((1, n_pad), lambda i, k: (0, 0)),          # gamma
        pl.BlockSpec((1, n_pad), lambda i, k: (0, 0)),          # beta
    ]
    operands += [wtp, bp, gp, betap]

    vmem_limit = int(min(56 * 2**20,
                         max(32 * 2**20, 1.5 * est_vmem(tm_c, tk_c))))

    out = pl.pallas_call(
        kernel,
        out_shape=jax.ShapeDtypeStruct((B_pad, n_pad), x.dtype),
        grid_spec=pltpu.PrefetchScalarGridSpec(
            num_scalar_prefetch=0,
            grid=(B_pad // tm_c, n_k),
            in_specs=in_specs,
            out_specs=pl.BlockSpec((tm_c, n_pad), lambda i, k: (i, 0)),
            scratch_shapes=[pltpu.VMEM((tm_c, n_pad), jnp.float32)],
        ),
        compiler_params=pltpu.CompilerParams(
            dimension_semantics=("parallel", "arbitrary"),
            vmem_limit_bytes=vmem_limit),
    )(*operands)

    if B_pad == B and n_pad == n_dim:
        return out
    return out[:B, :n_dim]


def mlp_reference(x, w, b, gamma, beta):
    h = jnp.maximum(x, 0.0)
    y = h @ w.T + b
    mean = jnp.mean(y, axis=-1, keepdims=True)
    var = jnp.mean((y - mean) ** 2, axis=-1, keepdims=True)
    y_ln = (y - mean) / jnp.sqrt(var + LN_EPS) * gamma + beta
    return x + y_ln


if __name__ == "__main__":
    n_dim = 32
    batch = 8

    key = jax.random.PRNGKey(0)
    kx, kw, kb, kx2 = jax.random.split(key, 4)

    x = jax.random.normal(kx, (batch, n_dim), dtype=jnp.float32)
    # Deterministic parameter init (mimic nn.Linear default ~ U(-1/sqrt(n), 1/sqrt(n)))
    bound = 1.0 / jnp.sqrt(jnp.float32(n_dim))
    w = jax.random.uniform(kw, (n_dim, n_dim), minval=-bound, maxval=bound,
                           dtype=jnp.float32)
    b = jax.random.uniform(kb, (n_dim,), minval=-bound, maxval=bound,
                           dtype=jnp.float32)
    gamma = jnp.ones((n_dim,), dtype=jnp.float32)   # LayerNorm default weight
    beta = jnp.zeros((n_dim,), dtype=jnp.float32)   # LayerNorm default bias

    out = jax.block_until_ready(mlp_forward(x, w, b, gamma, beta))
    ref = mlp_reference(x, w, b, gamma, beta)
    assert out.shape == (batch, n_dim)
    assert jnp.allclose(out, ref, atol=2e-5, rtol=2e-5), "mismatch vs reference"

    # Second check: batch not a multiple of the tile -> exercises batch padding
    # and a multi-step parallel grid axis.
    x2 = jax.random.normal(kx2, (20, n_dim), dtype=jnp.float32)
    out2 = jax.block_until_ready(mlp_forward(x2, w, b, gamma, beta))
    ref2 = mlp_reference(x2, w, b, gamma, beta)
    assert out2.shape == (20, n_dim)
    assert jnp.allclose(out2, ref2, atol=2e-5, rtol=2e-5), "mismatch vs reference (padded batch)"

    print("KERNEL_OK")
</pallas_src>

<mosaic_0001>
module attributes {stable_mosaic.version = 11 : i64} {
  func.func @mlp_kernel_fused(%arg0: i32, %arg1: i32, %arg2: memref<8x128xf32, #tpu.memory_space<vmem>>, %arg3: memref<128x128xf32, #tpu.memory_space<vmem>>, %arg4: memref<1x128xf32, #tpu.memory_space<vmem>>, %arg5: memref<1x128xf32, #tpu.memory_space<vmem>>, %arg6: memref<1x128xf32, #tpu.memory_space<vmem>>, %arg7: memref<8x128xf32, #tpu.memory_space<vmem>>, %arg8: memref<8x128xf32, #tpu.memory_space<vmem>>) attributes {dimension_semantics = [#tpu.dimension_semantics<parallel>, #tpu.dimension_semantics<arbitrary>], iteration_bounds = array<i64: 1, 1>, scalar_prefetch = 0 : i64, scratch_operands = 1 : i64, tpu.core_type = #tpu.core_type<tc>, window_params = [{transform_indices = @transform_0, window_bounds = array<i64: 8, 128>}, {transform_indices = @transform_1, window_bounds = array<i64: 128, 128>}, {pipeline_mode = #tpu.pipeline_mode<synchronous>, transform_indices = @transform_2, window_bounds = array<i64: 1, 128>}, {pipeline_mode = #tpu.pipeline_mode<synchronous>, transform_indices = @transform_3, window_bounds = array<i64: 1, 128>}, {pipeline_mode = #tpu.pipeline_mode<synchronous>, transform_indices = @transform_4, window_bounds = array<i64: 1, 128>}, {transform_indices = @transform_5, window_bounds = array<i64: 8, 128>}]} {
    %c0_i32 = arith.constant 0 : i32
    %0 = arith.cmpi eq, %arg1, %c0_i32 : i32
    %1 = arith.extui %0 : i1 to i32
    %c0_i32_0 = arith.constant 0 : i32
    %2 = arith.cmpi ne, %1, %c0_i32_0 : i32
    scf.if %2 {
      %cst_11 = arith.constant 0.000000e+00 : f32
      %14 = vector.broadcast %cst_11 : f32 to vector<8x128xf32>
      %c0_12 = arith.constant 0 : index
      %c0_13 = arith.constant 0 : index
      %15 = vector.load %arg8[%c0_12, %c0_13] : memref<8x128xf32, #tpu.memory_space<vmem>>, vector<8x128xf32>
      tpu.vector_store %arg8[%c0_12, %c0_13], %14 {strides = array<i32>} : memref<8x128xf32, #tpu.memory_space<vmem>>, vector<8x128xf32>,
    } else {
    }
    %c0 = arith.constant 0 : index
    %c0_1 = arith.constant 0 : index
    %3 = vector.load %arg2[%c0, %c0_1] : memref<8x128xf32, #tpu.memory_space<vmem>>, vector<8x128xf32>
    %cst = arith.constant 0.000000e+00 : f32
    %4 = vector.broadcast %cst : f32 to vector<8x128xf32>
    %5 = arith.maximumf %3, %4 : vector<8x128xf32>
    %c0_2 = arith.constant 0 : index
    %c0_3 = arith.constant 0 : index
    %6 = vector.load %arg8[%c0_2, %c0_3] : memref<8x128xf32, #tpu.memory_space<vmem>>, vector<8x128xf32>
    %c0_4 = arith.constant 0 : index
    %c0_5 = arith.constant 0 : index
    %7 = vector.load %arg3[%c0_4, %c0_5] : memref<128x128xf32, #tpu.memory_space<vmem>>, vector<128x128xf32>
    %cst_6 = arith.constant dense<0.000000e+00> : vector<8x128xf32>
    %8 = tpu.matmul %5, %7, %cst_6 {dimension_numbers = #tpu.dot_dimension_numbers<[1], [0], [0], [1], [0, 0, 1, 1], [], []>} : vector<8x128xf32>, vector<128x128xf32>, vector<8x128xf32> -> vector<8x128xf32>
    %9 = arith.addf %6, %8 : vector<8x128xf32>
    %c0_7 = arith.constant 0 : index
    %c0_8 = arith.constant 0 : index
    %10 = vector.load %arg8[%c0_7, %c0_8] : memref<8x128xf32, #tpu.memory_space<vmem>>, vector<8x128xf32>
    tpu.vector_store %arg8[%c0_7, %c0_8], %9 {strides = array<i32>} : memref<8x128xf32, #tpu.memory_space<vmem>>, vector<8x128xf32>,
    %c0_i32_9 = arith.constant 0 : i32
    %11 = arith.cmpi eq, %arg1, %c0_i32_9 : i32
    %12 = arith.extui %11 : i1 to i32
    %c0_i32_10 = arith.constant 0 : i32
    %13 = arith.cmpi ne, %12, %c0_i32_10 : i32
    scf.if %13 {
      %c0_11 = arith.constant 0 : index
      %c0_12 = arith.constant 0 : index
      %14 = vector.load %arg8[%c0_11, %c0_12] : memref<8x128xf32, #tpu.memory_space<vmem>>, vector<8x128xf32>
      %c0_13 = arith.constant 0 : index
      %c0_14 = arith.constant 0 : index
      %15 = vector.load %arg4[%c0_13, %c0_14] : memref<1x128xf32, #tpu.memory_space<vmem>>, vector<1x128xf32>
      %16 = vector.broadcast %15 : vector<1x128xf32> to vector<8x128xf32>
      %17 = arith.addf %14, %16 : vector<8x128xf32>
      %cst_15 = arith.constant dense<0.000000e+00> : vector<8xf32>
      %18 = vector.multi_reduction <add>, %17, %cst_15 [1] : vector<8x128xf32> to vector<8xf32>
      %19 = vector.shape_cast %18 : vector<8xf32> to vector<8x1xf32>
      %cst_16 = arith.constant 3.125000e-02 : f32
      %20 = vector.broadcast %cst_16 : f32 to vector<8x1xf32>
      %21 = arith.mulf %19, %20 : vector<8x1xf32>
      %22 = tpu.iota {dimensions = array<i32: 1>} : vector<8x128xi32>
      %c32_i32 = arith.constant 32 : i32
      %23 = vector.broadcast %c32_i32 : i32 to vector<8x128xi32>
      %24 = arith.cmpi slt, %22, %23 : vector<8x128xi32>
      %25 = arith.extui %24 : vector<8x128xi1> to vector<8x128xi32>
      %26 = arith.sitofp %25 : vector<8x128xi32> to vector<8x128xf32>
      %27 = vector.broadcast %21 : vector<8x1xf32> to vector<8x128xf32>
      %28 = arith.subf %17, %27 : vector<8x128xf32>
      %29 = arith.mulf %28, %26 : vector<8x128xf32>
      %30 = arith.mulf %29, %29 : vector<8x128xf32>
      %cst_17 = arith.constant dense<0.000000e+00> : vector<8xf32>
      %31 = vector.multi_reduction <add>, %30, %cst_17 [1] : vector<8x128xf32> to vector<8xf32>
      %32 = vector.shape_cast %31 : vector<8xf32> to vector<8x1xf32>
      %cst_18 = arith.constant 3.125000e-02 : f32
      %33 = vector.broadcast %cst_18 : f32 to vector<8x1xf32>
      %34 = arith.mulf %32, %33 : vector<8x1xf32>
      %35 = vector.broadcast %21 : vector<8x1xf32> to vector<8x128xf32>
      %36 = arith.subf %17, %35 : vector<8x128xf32>
      %cst_19 = arith.constant 9.99999974E-6 : f32
      %37 = vector.broadcast %cst_19 : f32 to vector<8x1xf32>
      %38 = arith.addf %34, %37 : vector<8x1xf32>
      %39 = math.rsqrt %38 : vector<8x1xf32>
      %40 = vector.broadcast %39 : vector<8x1xf32> to vector<8x128xf32>
      %41 = arith.mulf %36, %40 : vector<8x128xf32>
      %c0_20 = arith.constant 0 : index
      %c0_21 = arith.constant 0 : index
      %42 = vector.load %arg5[%c0_20, %c0_21] : memref<1x128xf32, #tpu.memory_space<vmem>>, vector<1x128xf32>
      %43 = vector.broadcast %42 : vector<1x128xf32> to vector<8x128xf32>
      %44 = arith.mulf %41, %43 : vector<8x128xf32>
      %c0_22 = arith.constant 0 : index
      %c0_23 = arith.constant 0 : index
      %45 = vector.load %arg6[%c0_22, %c0_23] : memref<1x128xf32, #tpu.memory_space<vmem>>, vector<1x128xf32>
      %46 = vector.broadcast %45 : vector<1x128xf32> to vector<8x128xf32>
      %47 = arith.addf %44, %46 : vector<8x128xf32>
      %c0_24 = arith.constant 0 : index
      %c0_25 = arith.constant 0 : index
      %48 = vector.load %arg2[%c0_24, %c0_25] : memref<8x128xf32, #tpu.memory_space<vmem>>, vector<8x128xf32>
      %49 = arith.addf %48, %47 : vector<8x128xf32>
      %c0_26 = arith.constant 0 : index
      %c0_27 = arith.constant 0 : index
      %50 = vector.load %arg7[%c0_26, %c0_27] : memref<8x128xf32, #tpu.memory_space<vmem>>, vector<8x128xf32>
      tpu.vector_store %arg7[%c0_26, %c0_27], %49 {strides = array<i32>} : memref<8x128xf32, #tpu.memory_space<vmem>>, vector<8x128xf32>,
    } else {
    }
    return
  }
  func.func @transform_0(%arg0: i32, %arg1: i32) -> (i32, i32) {
    %c0_i32 = arith.constant 0 : i32
    %c0_i32_0 = arith.constant 0 : i32
    return %arg0, %c0_i32 : i32, i32
  }
  func.func @transform_1(%arg0: i32, %arg1: i32) -> (i32, i32) {
    %c0_i32 = arith.constant 0 : i32
    %c0_i32_0 = arith.constant 0 : i32
    return %arg1, %c0_i32 : i32, i32
  }
  func.func @transform_2(%arg0: i32, %arg1: i32) -> (i32, i32) {
    %c0_i32 = arith.constant 0 : i32
    %c0_i32_0 = arith.constant 0 : i32
    %c0_i32_1 = arith.constant 0 : i32
    return %c0_i32, %c0_i32_0 : i32, i32
  }
  func.func @transform_3(%arg0: i32, %arg1: i32) -> (i32, i32) {
    %c0_i32 = arith.constant 0 : i32
    %c0_i32_0 = arith.constant 0 : i32
    %c0_i32_1 = arith.constant 0 : i32
    return %c0_i32, %c0_i32_0 : i32, i32
  }
  func.func @transform_4(%arg0: i32, %arg1: i32) -> (i32, i32) {
    %c0_i32 = arith.constant 0 : i32
    %c0_i32_0 = arith.constant 0 : i32
    %c0_i32_1 = arith.constant 0 : i32
    return %c0_i32, %c0_i32_0 : i32, i32
  }
  func.func @transform_5(%arg0: i32, %arg1: i32) -> (i32, i32) {
    %c0_i32 = arith.constant 0 : i32
    %c0_i32_0 = arith.constant 0 : i32
    return %arg0, %c0_i32 : i32, i32
  }
}

</mosaic_0001>

<bundles_post_ra>
// kernel: tpu_custom_call.1
= control target key start
LH: loop header
LB: loop body
LE: loop exit
PB: predicated region body
PF: predicated region fallthrough
CT: control target
= control target key end

     0   :  { %10 = vsyncpa [#allocation4], 0  ;;  %s411_s0 = inlined_call_operand.hbm [shape: f32[8,128], index: 0, kind: input, shape index: {}]   ;;  %s412_s1 = inlined_call_operand.hbm [shape: f32[128,128], index: 1, kind: input, shape index: {}]   ;;  %s413_s2 = inlined_call_operand.vmem [shape: f32[1,128], index: 2, kind: input, shape index: {}]   ;;  %s414_s3 = inlined_call_operand.vmem [shape: f32[1,128], index: 3, kind: input, shape index: {}]   ;;  %s415_s4 = inlined_call_operand.vmem [shape: f32[1,128], index: 4, kind: input, shape index: {}]   ;;  %s416_s5 = inlined_call_operand.hbm [shape: f32[8,128], index: 5, kind: output, shape index: {}]  }
   0x1   :  { %11 = vsyncpa [#allocation7], 0 }
   0x2   :  { %12 = vsyncpa [#allocation5], 0  ;;  %s338_s18 = smov [#allocation3]   ;;  %s339_s20 = smov [#allocation6]  }
   0x3   :  { %s19_s19 = sshll.u32 %s338_s18, 4  ;;  %s28_s21 = sshll.u32 %s339_s20, 4  ;;  %s20_s19 = int_to_ptr.vmem [resolvable:$true] %s19_s19  ;;  %s29_s21 = int_to_ptr.vmem [resolvable:$true] %s28_s21 }
   0x4   :  { %s280_s22 = scalar_lea.vmem %s20_s19, 128  ;;  %p285_p1 = scmp.lt.s32.totalorder %s20_s19, %s20_s19 }
   0x5   :  { %p281_p0 = scmp.ne.s32.totalorder %s20_s19, %s280_s22  ;;  %p286_p2 = scmp.lt.s32.totalorder %s280_s22, %s280_s22 }
   0x7   :  { %p287_p3 = por %p286_p2, %p285_p1 }
   0x9   :  { %p288_p4 = pnand %p287_p3, %p281_p0 }
   0xb   :  { %291 = shalt.err (!%p288_p4)
}
   0xc   :  { %22 = dma.hbm_to_vmem [thread:$0]  %s411_s0, 128, %s20_s19, [#allocation4]  }
   0xd   :  { %s300_s25 = scalar_lea.vmem %s29_s21, 2048  ;;  %p305_p6 = scmp.lt.s32.totalorder %s29_s21, %s29_s21 }
   0xe   :  { %p301_p5 = scmp.ne.s32.totalorder %s29_s21, %s300_s25  ;;  %p306_p7 = scmp.lt.s32.totalorder %s300_s25, %s300_s25 }
  0x10   :  { %p307_p8 = por %p306_p7, %p305_p6 }
  0x12   :  { %p308_p9 = pnand %p307_p8, %p301_p5 }
  0x14   :  { %311 = shalt.err (!%p308_p9)
}
  0x15   :  { %s340_s26 = smov 128   ;;  %s341_s27 = smov 8  }
  0x16   :  { %34 = dma.hbm_to_vmem [thread:$0]  %s412_s1, 2048, %s29_s21, [#allocation7], %s340_s26, %s340_s26, %s341_s27  }
  0x17   :  { %332 = dma.done.wait [#allocation4], 128  }
  0x18   :  { %333 = vsyncadd [#allocation4], 4294967168 }
  0x19   :  { %334 = dma.done.wait [#allocation7], 2048  }
  0x1a   :  { %335 = vsyncadd [#allocation7], 4294965248  ;;  %v342_v0 = vmov 0.0   ;;  %vm343_vm0 = vmmov 0   ;;  %v70_v1 = vld [vmem:[#allocation6 + $0x78] sm:$0xff]  ;;  %v69_v2 = vld [vmem:[#allocation6 + $0x70] sm:$0xff]  ;;  %v158_v23 = vlaneseq }
  0x1b   :  { %228 = vmatprep.subr.mxu0 %v342_v0  ;;  %260 = vmatprep.mubr.msk.f32.mxu0 %vm343_vm0, %v342_v0  ;;  %v68_v3 = vld [vmem:[#allocation6 + $0x68] sm:$0xff]  ;;  %v67_v4 = vld [vmem:[#allocation6 + $0x60] sm:$0xff]  ;;  %v66_v5 = vld [vmem:[#allocation6 + $0x58] sm:$0xff]  ;;  %s344_s8 = smov [#allocation8]  }
  0x1c   :  { %229 = vmatpush3.msra.mxu0 %v70_v1  ;;  %v65_v6 = vld [vmem:[#allocation6 + $0x50] sm:$0xff]  ;;  %v64_v7 = vld [vmem:[#allocation6 + $0x48] sm:$0xff]  ;;  %v63_v8 = vld [vmem:[#allocation6 + $0x40] sm:$0xff]  ;;  %v159_v24 = vand.u32 127, %v158_v23  ;;  %s197_s9 = sshll.u32 %s344_s8, 4  ;;  %s198_s9 = int_to_ptr.vmem [resolvable:$true] %s197_s9 }
  0x1d   :  { %230 = vmatprep.subr.mxu0 %v342_v0  ;;  %v62_v9 = vld [vmem:[#allocation6 + $0x38] sm:$0xff]  ;;  %v61_v10 = vld [vmem:[#allocation6 + $0x30] sm:$0xff]  ;;  %v60_v11 = vld [vmem:[#allocation6 + $0x28] sm:$0xff]  ;;  %s312_s10 = scalar_lea.vmem %s198_s9, 128  ;;  %p317_p11 = scmp.lt.s32.totalorder %s198_s9, %s198_s9 }
  0x1e   :  { %231 = vmatpush3.msra.mxu0 %v69_v2  ;;  %v59_v12 = vld [vmem:[#allocation6 + $0x20] sm:$0xff]  ;;  %v58_v13 = vld [vmem:[#allocation6 + $0x18] sm:$0xff]  ;;  %v57_v14 = vld [vmem:[#allocation6 + $0x10] sm:$0xff]  ;;  %vm160_vm1 = vcmp.lt.s32.totalorder %v159_v24, 32  ;;  %p313_p10 = scmp.ne.s32.totalorder %s198_s9, %s312_s10  ;;  %p318_p12 = scmp.lt.s32.totalorder %s312_s10, %s312_s10 }
  0x1f   :  { %232 = vmatprep.subr.mxu0 %v342_v0  ;;  %v52_v15 = vld [vmem:[#allocation3] sm:$0xff]  ;;  %v56_v16 = vld [vmem:[#allocation6 + $0x8] sm:$0xff]  ;;  %v55_v17 = vld [vmem:[#allocation6] sm:$0xff]  ;;  %v208_v27 = vsel %vm160_vm1, 1.0, %v342_v0 }
  0x20   :  { %233 = vmatpush3.msra.mxu0 %v68_v3  ;;  %v53_v18 = vmax.f32 %v52_v15, 0.0  ;;  %v207_v19 = vld [vmem:[%s413_s2] ss:$0 sm:$0xff]  ;;  %p319_p13 = por %p318_p12, %p317_p11 }
  0x21   :  { %234 = vmatprep.subr.mxu0 %v342_v0  ;;  %v209_v35 = vld [vmem:[%s414_s3] ss:$0 sm:$0xff] }
  0x22   :  { %235 = vmatpush3.msra.mxu0 %v67_v4  ;;  %v210_v37 = vld [vmem:[%s415_s4] ss:$0 sm:$0xff]  ;;  %p320_p0 = pnand %p319_p13, %p313_p10 }
  0x23   :  { %236 = vmatprep.subr.mxu0 %v342_v0 }
  0x24   :  { %237 = vmatpush3.msra.mxu0 %v66_v5 }
  0x25   :  { %238 = vmatprep.subr.mxu0 %v342_v0 }
  0x26   :  { %239 = vmatpush3.msra.mxu0 %v65_v6 }
  0x27   :  { %240 = vmatprep.subr.mxu0 %v342_v0 }
  0x28   :  { %241 = vmatpush3.msra.mxu0 %v64_v7 }
  0x29   :  { %242 = vmatprep.subr.mxu0 %v342_v0 }
  0x2a   :  { %243 = vmatpush3.msra.mxu0 %v63_v8 }
  0x2b   :  { %244 = vmatprep.subr.mxu0 %v342_v0 }
  0x2c   :  { %245 = vmatpush3.msra.mxu0 %v62_v9 }
  0x2d   :  { %246 = vmatprep.subr.mxu0 %v342_v0 }
  0x2e   :  { %247 = vmatpush3.msra.mxu0 %v61_v10 }
  0x2f   :  { %248 = vmatprep.subr.mxu0 %v342_v0 }
  0x30   :  { %249 = vmatpush3.msra.mxu0 %v60_v11 }
  0x31   :  { %250 = vmatprep.subr.mxu0 %v342_v0 }
  0x32   :  { %251 = vmatpush3.msra.mxu0 %v59_v12 }
  0x33   :  { %252 = vmatprep.subr.mxu0 %v342_v0 }
  0x34   :  { %253 = vmatpush3.msra.mxu0 %v58_v13 }
  0x35   :  { %254 = vmatprep.subr.mxu0 %v342_v0 }
  0x36   :  { %255 = vmatpush3.msra.mxu0 %v57_v14 }
  0x37   :  { %256 = vmatprep.subr.mxu0 %v342_v0 }
  0x38   :  { %257 = vmatpush3.msra.mxu0 %v56_v16 }
  0x39   :  { %258 = vmatprep.subr.mxu0 %v342_v0 }
  0x3a   :  { %259 = vmatpush3.msra.mxu0 %v55_v17 }
  0x3b   :  { %261 = vmatmul.mubr.f32.vlgmr.msra.gmra.mxu0 %v53_v18 }
  0xfb   :  { %v137_v20 = vpop.f32.mrf.mxu0 }
  0xfc   :  { %v154_v21 = vadd.f32 %v207_v19, %v137_v20 }
  0xfd   :  { %v262_v22 = vpop.f32.mrf.mxu0 }
  0xfe   :  { %155 = vadd.xlane.f32.xlu0 %v154_v21 }
 0x187   :  { %v156_v25 = vpop.xlane.xlu0 %155 }
 0x188   :  { %v157_v26 = vmul.f32 0.03125, %v156_v25 }
 0x18a   :  { %v163_v28 = vsub.f32 %v154_v21, %v157_v26 }
 0x18c   :  { %v164_v29 = vmul.f32 %v208_v27, %v163_v28 }
 0x18e   :  { %v165_v30 = vmul.f32 %v164_v29, %v164_v29 }
 0x190   :  { %166 = vadd.xlane.f32.xlu0 %v165_v30 }
 0x219   :  { %v167_v31 = vpop.xlane.xlu0 %166 }
 0x21a   :  { %v168_v32 = vmul.f32 0.03125, %v167_v31 }
 0x21c   :  { %v169_v33 = vadd.f32 1e-05, %v168_v32 }
 0x21e   :  { %270 = vrsqrt.f32 %v169_v33 }
 0x22b   :  { %v271_v34 = vpop.eup %270 }
 0x22c   :  { %v171_v36 = vmul.f32 %v271_v34, %v163_v28 }
 0x22e   :  { %v179_v38 = vmul.f32 %v209_v35, %v171_v36 }
 0x230   :  { %v187_v39 = vadd.f32 %v210_v37, %v179_v38 }
 0x232   :  { %v189_v40 = vadd.f32 %v187_v39, %v52_v15 }
 0x234   :  { %190 = vst [vmem:[#allocation8] sm:$0xff] %v189_v40 }
 0x235   :  { %323 = shalt.err (!%p320_p0)
}
 0x236   :  { %200 = dma.vmem_to_hbm [thread:$0]  %s198_s9, 128, %s416_s5, [#allocation5]  }
 0x237   :  { %336 = dma.done.wait [#allocation5], 128  }
 0x238   :  { %337 = vsyncadd [#allocation5], 4294967168 }
 0x239   :  { %204 = vsyncpa [#allocation4], 1 }
 0x23a   :  { %205 = vsyncpa [#allocation7], 1 }
 0x23b   :  { %206 = vsyncpa [#allocation5], 1 }

</bundles_post_ra>
